<compile_context>
chip_gen: v7x
topology: tpu7x:2x2x1
jax: 0.10.0
libtpu: 0.0.40
codegen_flags: <defaults>
</compile_context>

<pallas_src>
import functools

import jax
import jax.numpy as jnp
from jax.experimental import pallas as pl
from jax.experimental.pallas import tpu as pltpu

K = 5          # Conv1d kernel_size
PAD = 4        # padding=4 + dropping the last 4 outputs == causal left context of 4 rows
LPAD = 8       # sublane-aligned left pad used inside the VMEM scratch buffers
BN_EPS = 1e-5


# ----------------------------------- the kernel -----------------------------------------
def postnet_kernel(x_ref, w1_ref, wmid_ref, w5_ref, b14_ref, b5_ref, out_ref,
                   xbuf_ref, hbuf_ref, hh_ref):
    B_t, T_t, M = x_ref.shape
    H = hbuf_ref.shape[-1]
    rows = B_t * T_t

    # First time tile of each batch block: the causal left context is all zeros
    # (== the 4 zero rows that PyTorch's padding=4 + [:, :, :-4] implies).
    @pl.when(pl.program_id(1) == 0)
    def _():
        xbuf_ref[:, LPAD - PAD:LPAD, :] = jnp.zeros((B_t, PAD, M), jnp.float32)
        hh_ref[...] = jnp.zeros_like(hh_ref)

    def causal_conv(buf_ref, w, bias):
        # out[j] = bias + sum_k buf[LPAD - PAD + j + k] @ W_k    for j in [0, T_t)
        # Single MXU dot: im2col the K shifted windows along the lane axis (bf16 in,
        # f32 accumulate).
        cin = buf_ref.shape[-1]
        taps = [buf_ref[:, LPAD - PAD + k:LPAD - PAD + k + T_t, :].reshape(rows, cin)
                for k in range(K)]
        cat = jnp.concatenate(taps, axis=-1).astype(jnp.bfloat16)
        return jnp.dot(cat, w, preferred_element_type=jnp.float32) + bias

    # ---- layer 1: conv1 + folded BatchNorm1 + tanh (dropout == identity) ---------------
    xbuf_ref[:, LPAD:, :] = x_ref[...]                          # sublane-aligned store
    a = causal_conv(xbuf_ref, w1_ref[...], b14_ref[0:1, :])
    xbuf_ref[:, LPAD - PAD:LPAD, :] = x_ref[:, T_t - PAD:, :]   # x halo for next time tile
    h = jnp.tanh(a).reshape(B_t, T_t, H)

    # ---- layers 2-4: conv + folded BatchNorm + tanh -------------------------------------
    for i in range(3):
        hbuf_ref[:, LPAD - PAD:LPAD, :] = hh_ref[i]             # previous-tile halo
        hh_ref[i] = h[:, T_t - PAD:, :]                         # halo for next time tile
        hbuf_ref[:, LPAD:, :] = h                               # sublane-aligned store
        a = causal_conv(hbuf_ref, wmid_ref[i], b14_ref[i + 1:i + 2, :])
        h = jnp.tanh(a).reshape(B_t, T_t, H)

    # ---- layer 5: conv5 (no BatchNorm, no tanh); output lane-padded ---------------------
    hbuf_ref[:, LPAD - PAD:LPAD, :] = hh_ref[3]
    hh_ref[3] = h[:, T_t - PAD:, :]
    hbuf_ref[:, LPAD:, :] = h
    a = causal_conv(hbuf_ref, w5_ref[...], b5_ref[...])
    out_ref[...] = a.reshape(B_t, T_t, out_ref.shape[-1])


# ----------------------------------- wrapper --------------------------------------------
def _round_up(n, m):
    return ((n + m - 1) // m) * m


def _num_tensorcores():
    # Only split the batch across grid steps where >1 TensorCore exists (v4/v5p megacore,
    # v7x); on single-TC parts (v5e/v6e) a multi-step batch grid is just a serial loop.
    try:
        kind = jax.devices()[0].device_kind.lower()
    except Exception:
        return 1
    if "lite" in kind or "v5e" in kind or "v6e" in kind:
        return 1
    if any(t in kind for t in ("v4", "v5p", "v5", "v7", "7x")):
        return 2
    return 1


def _vmem_limit_bytes():
    # Headroom-aware scoped-VMEM limit (v7x has only 64 MiB physical per TensorCore).
    try:
        cap = int(pltpu.get_tpu_info().vmem_capacity_bytes)
    except Exception:
        cap = 64 * 1024 * 1024
    return min(96 * 1024 * 1024, (cap * 3) // 4)


def _pick_t_tile(T, target=256):
    if T <= target:
        return T
    for tt in range(target, 7, -1):              # prefer sublane-aligned divisors
        if T % tt == 0 and tt % 8 == 0:
            return tt
    for tt in range(target, 0, -1):
        if T % tt == 0:
            return tt
    return T


@functools.partial(jax.jit, static_argnames=("t_tile",))
def postnet_forward(x, params, t_tile=None):
    B, T, M = x.shape
    H = params["b14"].shape[1]
    Mp = params["w5"].shape[1]                   # mel dim lane-padded to a multiple of 128
    assert params["w1"].shape[0] == K * M

    if t_tile is None:
        t_tile = _pick_t_tile(T)
    assert T % t_tile == 0 and t_tile >= PAD
    n_t = T // t_tile

    n_tc = _num_tensorcores()
    bb = n_tc if (n_tc > 1 and B % n_tc == 0) else 1
    B_t = B // bb

    flops = 2 * B * T * K * (M * H + 3 * H * H + H * Mp)
    bytes_accessed = (4 * x.size + 4 * B * T * Mp
                      + 2 * (params["w1"].size + params["wmid"].size + params["w5"].size)
                      + 4 * (params["b14"].size + params["b5"].size))
    cost = pl.CostEstimate(flops=flops, transcendentals=4 * B * T * H,
                           bytes_accessed=bytes_accessed)

    grid_spec = pltpu.PrefetchScalarGridSpec(
        num_scalar_prefetch=0,
        grid=(bb, n_t),                                    # (parallel batch, sequential time)
        in_specs=[
            pl.BlockSpec((B_t, t_tile, M), lambda b, t: (b, t, 0)),   # x time tile
            pl.BlockSpec((K * M, H), lambda b, t: (0, 0)),            # conv1 taps (BN folded)
            pl.BlockSpec((3, K * H, H), lambda b, t: (0, 0, 0)),      # conv2-4 taps (BN folded)
            pl.BlockSpec((K * H, Mp), lambda b, t: (0, 0)),           # conv5 taps (lane-padded)
            pl.BlockSpec((4, H), lambda b, t: (0, 0)),                # layer 1-4 biases (folded)
            pl.BlockSpec((1, Mp), lambda b, t: (0, 0)),               # conv5 bias (lane-padded)
        ],
        out_specs=pl.BlockSpec((B_t, t_tile, Mp), lambda b, t: (b, t, 0)),
        scratch_shapes=[
            pltpu.VMEM((B_t, LPAD + t_tile, M), jnp.float32),   # padded x tile
            pltpu.VMEM((B_t, LPAD + t_tile, H), jnp.float32),   # padded hidden tile
            pltpu.VMEM((4, B_t, PAD, H), jnp.float32),          # per-layer causal halos
        ],
    )

    out_padded = pl.pallas_call(
        postnet_kernel,
        out_shape=jax.ShapeDtypeStruct((B, T, Mp), jnp.float32),
        grid_spec=grid_spec,
        compiler_params=pltpu.CompilerParams(
            dimension_semantics=("parallel", "arbitrary"),
            vmem_limit_bytes=_vmem_limit_bytes()),
        cost_estimate=cost,
    )(x, params["w1"], params["wmid"], params["w5"], params["b14"], params["b5"])

    return out_padded[:, :, :M] if Mp != M else out_padded


# --------------------------- parameter prep (BN folding) --------------------------------
def fold_bn(w_oik, cb, g, be, m, v):
    scale = g * jax.lax.rsqrt(v + BN_EPS)                              # (Cout,)
    w_taps = jnp.transpose(w_oik, (2, 1, 0)) * scale[None, None, :]    # (K, Cin, Cout)
    bias = (cb - m) * scale + be
    return w_taps, bias


def pack_kernel_params(raw):
    hid, mel, _ = raw["w1"].shape
    mp = _round_up(mel, 128)                       # lane-dense kernel output width

    w1, b1 = fold_bn(raw["w1"], raw["cb1"], raw["g1"], raw["be1"], raw["m1"], raw["v1"])
    mids, biases = [], [b1]
    for i in range(2, 5):
        wt, bt = fold_bn(raw[f"w{i}"], raw[f"cb{i}"], raw[f"g{i}"], raw[f"be{i}"],
                         raw[f"m{i}"], raw[f"v{i}"])
        mids.append(wt.reshape(K * hid, hid))
        biases.append(bt)

    w5 = jnp.transpose(raw["w5"], (2, 1, 0)).reshape(K * hid, mel)
    return {
        "w1": w1.reshape(K * mel, hid).astype(jnp.bfloat16),             # (5*mel, hid)
        "wmid": jnp.stack(mids, axis=0).astype(jnp.bfloat16),            # (3, 5*hid, hid)
        "w5": jnp.pad(w5, ((0, 0), (0, mp - mel))).astype(jnp.bfloat16),  # (5*hid, mp)
        "b14": jnp.stack(biases, axis=0).astype(jnp.float32),            # (4, hid)
        "b5": jnp.pad(raw["cb5"], (0, mp - mel))[None, :].astype(jnp.float32),  # (1, mp)
    }


def init_raw_params(key, mel_dims, hidden_dims):
    ks = jax.random.split(key, 14)

    def wconv(k, co, ci):
        return jax.random.normal(k, (co, ci, K), jnp.float32) * 0.1

    def bvec(k, c):
        return jax.random.normal(k, (c,), jnp.float32) * 0.1

    raw = {
        "w1": wconv(ks[0], hidden_dims, mel_dims), "cb1": bvec(ks[1], hidden_dims),
        "w5": wconv(ks[8], mel_dims, hidden_dims), "cb5": bvec(ks[9], mel_dims),
    }
    for i in range(3):
        raw[f"w{i + 2}"] = wconv(ks[2 + 2 * i], hidden_dims, hidden_dims)
        raw[f"cb{i + 2}"] = bvec(ks[3 + 2 * i], hidden_dims)
    for i in range(4):  # eval-mode BatchNorm running stats / affine
        kk = jax.random.split(ks[10 + i], 4)
        raw[f"g{i + 1}"] = 1.0 + 0.1 * jax.random.normal(kk[0], (hidden_dims,), jnp.float32)
        raw[f"be{i + 1}"] = 0.1 * jax.random.normal(kk[1], (hidden_dims,), jnp.float32)
        raw[f"m{i + 1}"] = 0.1 * jax.random.normal(kk[2], (hidden_dims,), jnp.float32)
        raw[f"v{i + 1}"] = 1.0 + 0.25 * jnp.abs(
            jax.random.normal(kk[3], (hidden_dims,), jnp.float32))
    return raw


# ----------------------------- pure-JAX reference ----------------------------------------
def postnet_ref(x, raw):
    h = jnp.transpose(x, (0, 2, 1))                    # (B, C, T) == x.transpose(1, 2)

    def conv(h, w, b):
        y = jax.lax.conv_general_dilated(
            h, w, window_strides=(1,), padding=[(PAD, PAD)],
            dimension_numbers=("NCH", "OIH", "NCH"),
            precision=jax.lax.Precision.HIGHEST)
        return y[:, :, :-PAD] + b[None, :, None]

    def bn(h, g, be, m, v):
        inv = jax.lax.rsqrt(v + BN_EPS)
        return ((h - m[None, :, None]) * inv[None, :, None] * g[None, :, None]
                + be[None, :, None])

    h = jnp.tanh(bn(conv(h, raw["w1"], raw["cb1"]),
                    raw["g1"], raw["be1"], raw["m1"], raw["v1"]))
    for i in range(2, 5):
        h = jnp.tanh(bn(conv(h, raw[f"w{i}"], raw[f"cb{i}"]),
                        raw[f"g{i}"], raw[f"be{i}"], raw[f"m{i}"], raw[f"v{i}"]))
    out = conv(h, raw["w5"], raw["cb5"])
    return jnp.transpose(out, (0, 2, 1))               # back to (B, T, mel)


if __name__ == "__main__":
    MEL_DIMS, HIDDEN_DIMS = 16, 32
    B, T = 2, 32

    root = jax.random.PRNGKey(0)
    kx, kp = jax.random.split(root)
    x = jax.random.normal(kx, (B, T, MEL_DIMS), jnp.float32)

    raw = init_raw_params(kp, MEL_DIMS, HIDDEN_DIMS)
    params = pack_kernel_params(raw)
    ref = jax.block_until_ready(postnet_ref(x, raw))

    # t_tile=8 exercises the multi-tile time grid with causal-halo carry; None uses the
    # default (single tile at this size).
    for tt in (8, None):
        out = jax.block_until_ready(postnet_forward(x, params, t_tile=tt))
        assert out.shape == (B, T, MEL_DIMS)
        assert bool(jnp.all(jnp.isfinite(out)))
        max_err = float(jnp.max(jnp.abs(out - ref)))
        # bf16 MXU operands with f32 accumulation: loose but meaningful tolerance.
        assert max_err < 5e-2, f"mismatch vs reference (t_tile={tt}): max abs err={max_err}"
    print("KERNEL_OK")
</pallas_src>

<mosaic_0001>
module attributes {stable_mosaic.version = 11 : i64} {
  func.func @postnet_kernel(%arg0: i32, %arg1: i32, %arg2: memref<2x8x16xf32, #tpu.memory_space<vmem>>, %arg3: memref<80x32xbf16, #tpu.memory_space<vmem>>, %arg4: memref<3x160x32xbf16, #tpu.memory_space<vmem>>, %arg5: memref<160x128xbf16, #tpu.memory_space<vmem>>, %arg6: memref<4x32xf32, #tpu.memory_space<vmem>>, %arg7: memref<1x128xf32, #tpu.memory_space<vmem>>, %arg8: memref<2x8x128xf32, #tpu.memory_space<vmem>>, %arg9: memref<2x16x16xf32, #tpu.memory_space<vmem>>, %arg10: memref<2x16x32xf32, #tpu.memory_space<vmem>>, %arg11: memref<4x2x4x32xf32, #tpu.memory_space<vmem>>) attributes {dimension_semantics = [#tpu.dimension_semantics<parallel>, #tpu.dimension_semantics<arbitrary>], iteration_bounds = array<i64: 1, 4>, scalar_prefetch = 0 : i64, scratch_operands = 3 : i64, tpu.core_type = #tpu.core_type<tc>, window_params = [{transform_indices = @transform_0, window_bounds = array<i64: 2, 8, 16>}, {pipeline_mode = #tpu.pipeline_mode<synchronous>, transform_indices = @transform_1, window_bounds = array<i64: 80, 32>}, {pipeline_mode = #tpu.pipeline_mode<synchronous>, transform_indices = @transform_2, window_bounds = array<i64: 3, 160, 32>}, {pipeline_mode = #tpu.pipeline_mode<synchronous>, transform_indices = @transform_3, window_bounds = array<i64: 160, 128>}, {pipeline_mode = #tpu.pipeline_mode<synchronous>, transform_indices = @transform_4, window_bounds = array<i64: 4, 32>}, {pipeline_mode = #tpu.pipeline_mode<synchronous>, transform_indices = @transform_5, window_bounds = array<i64: 1, 128>}, {transform_indices = @transform_6, window_bounds = array<i64: 2, 8, 128>}]} {
    %c0_i32 = arith.constant 0 : i32
    %0 = arith.cmpi eq, %arg1, %c0_i32 : i32
    %1 = arith.extui %0 : i1 to i32
    %c0_i32_0 = arith.constant 0 : i32
    %2 = arith.cmpi ne, %1, %c0_i32_0 : i32
    scf.if %2 {
      %cst_165 = arith.constant 0.000000e+00 : f32
      %137 = vector.broadcast %cst_165 : f32 to vector<2x4x16xf32>
      %c0_166 = arith.constant 0 : index
      %c4_167 = arith.constant 4 : index
      %c0_168 = arith.constant 0 : index
      %138 = vector.load %arg9[%c0_166, %c4_167, %c0_168] : memref<2x16x16xf32, #tpu.memory_space<vmem>>, vector<2x4x16xf32>
      tpu.vector_store %arg9[%c0_166, %c4_167, %c0_168], %137 {strides = array<i32>} : memref<2x16x16xf32, #tpu.memory_space<vmem>>, vector<2x4x16xf32>,
      %cst_169 = arith.constant 0.000000e+00 : f32
      %139 = vector.broadcast %cst_169 : f32 to vector<4x2x4x32xf32>
      %c0_170 = arith.constant 0 : index
      %c0_171 = arith.constant 0 : index
      %c0_172 = arith.constant 0 : index
      %c0_173 = arith.constant 0 : index
      %140 = vector.load %arg11[%c0_170, %c0_171, %c0_172, %c0_173] : memref<4x2x4x32xf32, #tpu.memory_space<vmem>>, vector<4x2x4x32xf32>
      tpu.vector_store %arg11[%c0_170, %c0_171, %c0_172, %c0_173], %139 {strides = array<i32>} : memref<4x2x4x32xf32, #tpu.memory_space<vmem>>, vector<4x2x4x32xf32>,
    } else {
    }
    %c0 = arith.constant 0 : index
    %c0_1 = arith.constant 0 : index
    %c0_2 = arith.constant 0 : index
    %3 = vector.load %arg2[%c0, %c0_1, %c0_2] : memref<2x8x16xf32, #tpu.memory_space<vmem>>, vector<2x8x16xf32>
    %c0_3 = arith.constant 0 : index
    %c8 = arith.constant 8 : index
    %c0_4 = arith.constant 0 : index
    %4 = vector.load %arg9[%c0_3, %c8, %c0_4] : memref<2x16x16xf32, #tpu.memory_space<vmem>>, vector<2x8x16xf32>
    tpu.vector_store %arg9[%c0_3, %c8, %c0_4], %3 {strides = array<i32>} : memref<2x16x16xf32, #tpu.memory_space<vmem>>, vector<2x8x16xf32>,
    %c0_5 = arith.constant 0 : index
    %c0_6 = arith.constant 0 : index
    %5 = vector.load %arg3[%c0_5, %c0_6] : memref<80x32xbf16, #tpu.memory_space<vmem>>, vector<80x32xbf16>
    %c0_7 = arith.constant 0 : index
    %c0_8 = arith.constant 0 : index
    %6 = vector.load %arg6[%c0_7, %c0_8] : memref<4x32xf32, #tpu.memory_space<vmem>>, vector<1x32xf32>
    %c0_9 = arith.constant 0 : index
    %c4 = arith.constant 4 : index
    %c0_10 = arith.constant 0 : index
    %7 = vector.load %arg9[%c0_9, %c4, %c0_10] : memref<2x16x16xf32, #tpu.memory_space<vmem>>, vector<2x8x16xf32>
    %8 = vector.shape_cast %7 : vector<2x8x16xf32> to vector<16x16xf32>
    %c0_11 = arith.constant 0 : index
    %c5 = arith.constant 5 : index
    %c0_12 = arith.constant 0 : index
    %9 = vector.load %arg9[%c0_11, %c5, %c0_12] : memref<2x16x16xf32, #tpu.memory_space<vmem>>, vector<2x8x16xf32>
    %10 = vector.shape_cast %9 : vector<2x8x16xf32> to vector<16x16xf32>
    %c0_13 = arith.constant 0 : index
    %c6 = arith.constant 6 : index
    %c0_14 = arith.constant 0 : index
    %11 = vector.load %arg9[%c0_13, %c6, %c0_14] : memref<2x16x16xf32, #tpu.memory_space<vmem>>, vector<2x8x16xf32>
    %12 = vector.shape_cast %11 : vector<2x8x16xf32> to vector<16x16xf32>
    %c0_15 = arith.constant 0 : index
    %c7 = arith.constant 7 : index
    %c0_16 = arith.constant 0 : index
    %13 = vector.load %arg9[%c0_15, %c7, %c0_16] : memref<2x16x16xf32, #tpu.memory_space<vmem>>, vector<2x8x16xf32>
    %14 = vector.shape_cast %13 : vector<2x8x16xf32> to vector<16x16xf32>
    %c0_17 = arith.constant 0 : index
    %c8_18 = arith.constant 8 : index
    %c0_19 = arith.constant 0 : index
    %15 = vector.load %arg9[%c0_17, %c8_18, %c0_19] : memref<2x16x16xf32, #tpu.memory_space<vmem>>, vector<2x8x16xf32>
    %16 = vector.shape_cast %15 : vector<2x8x16xf32> to vector<16x16xf32>
    %17 = tpu.concatenate %8, %10, %12, %14, %16 in 1 : vector<16x16xf32>, vector<16x16xf32>, vector<16x16xf32>, vector<16x16xf32>, vector<16x16xf32> -> vector<16x80xf32>
    %18 = arith.truncf %17 : vector<16x80xf32> to vector<16x80xbf16>
    %cst = arith.constant dense<0.000000e+00> : vector<16x32xf32>
    %19 = tpu.matmul %18, %5, %cst {dimension_numbers = #tpu.dot_dimension_numbers<[1], [0], [0], [1], [0, 0, 1, 1], [], []>} : vector<16x80xbf16>, vector<80x32xbf16>, vector<16x32xf32> -> vector<16x32xf32>
    %20 = vector.broadcast %6 : vector<1x32xf32> to vector<16x32xf32>
    %21 = arith.addf %19, %20 : vector<16x32xf32>
    %c0_20 = arith.constant 0 : index
    %c4_21 = arith.constant 4 : index
    %c0_22 = arith.constant 0 : index
    %22 = vector.load %arg2[%c0_20, %c4_21, %c0_22] : memref<2x8x16xf32, #tpu.memory_space<vmem>>, vector<2x4x16xf32>
    %c0_23 = arith.constant 0 : index
    %c4_24 = arith.constant 4 : index
    %c0_25 = arith.constant 0 : index
    %23 = vector.load %arg9[%c0_23, %c4_24, %c0_25] : memref<2x16x16xf32, #tpu.memory_space<vmem>>, vector<2x4x16xf32>
    tpu.vector_store %arg9[%c0_23, %c4_24, %c0_25], %22 {strides = array<i32>} : memref<2x16x16xf32, #tpu.memory_space<vmem>>, vector<2x4x16xf32>,
    %24 = math.tanh %21 : vector<16x32xf32>
    %25 = vector.shape_cast %24 : vector<16x32xf32> to vector<2x8x32xf32>
    %c0_26 = arith.constant 0 : index
    %c0_27 = arith.constant 0 : index
    %c0_28 = arith.constant 0 : index
    %c0_29 = arith.constant 0 : index
    %26 = vector.load %arg11[%c0_26, %c0_27, %c0_28, %c0_29] : memref<4x2x4x32xf32, #tpu.memory_space<vmem>>, vector<1x2x4x32xf32>
    %27 = vector.shape_cast %26 : vector<1x2x4x32xf32> to vector<2x4x32xf32>
    %c0_30 = arith.constant 0 : index
    %c4_31 = arith.constant 4 : index
    %c0_32 = arith.constant 0 : index
    %28 = vector.load %arg10[%c0_30, %c4_31, %c0_32] : memref<2x16x32xf32, #tpu.memory_space<vmem>>, vector<2x4x32xf32>
    tpu.vector_store %arg10[%c0_30, %c4_31, %c0_32], %27 {strides = array<i32>} : memref<2x16x32xf32, #tpu.memory_space<vmem>>, vector<2x4x32xf32>,
    %29 = vector.extract_strided_slice %25 {offsets = [0, 4, 0], sizes = [2, 4, 32], strides = [1, 1, 1]} : vector<2x8x32xf32> to vector<2x4x32xf32>
    %c0_33 = arith.constant 0 : index
    %c0_34 = arith.constant 0 : index
    %c0_35 = arith.constant 0 : index
    %c0_36 = arith.constant 0 : index
    %30 = vector.load %arg11[%c0_33, %c0_34, %c0_35, %c0_36] : memref<4x2x4x32xf32, #tpu.memory_space<vmem>>, vector<1x2x4x32xf32>
    %31 = vector.shape_cast %30 : vector<1x2x4x32xf32> to vector<2x4x32xf32>
    %32 = vector.shape_cast %29 : vector<2x4x32xf32> to vector<1x2x4x32xf32>
    tpu.vector_store %arg11[%c0_33, %c0_34, %c0_35, %c0_36], %32 {strides = array<i32>} : memref<4x2x4x32xf32, #tpu.memory_space<vmem>>, vector<1x2x4x32xf32>,
    %c0_37 = arith.constant 0 : index
    %c8_38 = arith.constant 8 : index
    %c0_39 = arith.constant 0 : index
    %33 = vector.load %arg10[%c0_37, %c8_38, %c0_39] : memref<2x16x32xf32, #tpu.memory_space<vmem>>, vector<2x8x32xf32>
    tpu.vector_store %arg10[%c0_37, %c8_38, %c0_39], %25 {strides = array<i32>} : memref<2x16x32xf32, #tpu.memory_space<vmem>>, vector<2x8x32xf32>,
    %c0_40 = arith.constant 0 : index
    %c0_41 = arith.constant 0 : index
    %c0_42 = arith.constant 0 : index
    %34 = vector.load %arg4[%c0_40, %c0_41, %c0_42] : memref<3x160x32xbf16, #tpu.memory_space<vmem>>, vector<1x160x32xbf16>
    %35 = vector.shape_cast %34 : vector<1x160x32xbf16> to vector<160x32xbf16>
    %c1 = arith.constant 1 : index
    %c0_43 = arith.constant 0 : index
    %36 = vector.load %arg6[%c1, %c0_43] : memref<4x32xf32, #tpu.memory_space<vmem>>, vector<1x32xf32>
    %c0_44 = arith.constant 0 : index
    %c4_45 = arith.constant 4 : index
    %c0_46 = arith.constant 0 : index
    %37 = vector.load %arg10[%c0_44, %c4_45, %c0_46] : memref<2x16x32xf32, #tpu.memory_space<vmem>>, vector<2x8x32xf32>
    %38 = vector.shape_cast %37 : vector<2x8x32xf32> to vector<16x32xf32>
    %c0_47 = arith.constant 0 : index
    %c5_48 = arith.constant 5 : index
    %c0_49 = arith.constant 0 : index
    %39 = vector.load %arg10[%c0_47, %c5_48, %c0_49] : memref<2x16x32xf32, #tpu.memory_space<vmem>>, vector<2x8x32xf32>
    %40 = vector.shape_cast %39 : vector<2x8x32xf32> to vector<16x32xf32>
    %c0_50 = arith.constant 0 : index
    %c6_51 = arith.constant 6 : index
    %c0_52 = arith.constant 0 : index
    %41 = vector.load %arg10[%c0_50, %c6_51, %c0_52] : memref<2x16x32xf32, #tpu.memory_space<vmem>>, vector<2x8x32xf32>
    %42 = vector.shape_cast %41 : vector<2x8x32xf32> to vector<16x32xf32>
    %c0_53 = arith.constant 0 : index
    %c7_54 = arith.constant 7 : index
    %c0_55 = arith.constant 0 : index
    %43 = vector.load %arg10[%c0_53, %c7_54, %c0_55] : memref<2x16x32xf32, #tpu.memory_space<vmem>>, vector<2x8x32xf32>
    %44 = vector.shape_cast %43 : vector<2x8x32xf32> to vector<16x32xf32>
    %c0_56 = arith.constant 0 : index
    %c8_57 = arith.constant 8 : index
    %c0_58 = arith.constant 0 : index
    %45 = vector.load %arg10[%c0_56, %c8_57, %c0_58] : memref<2x16x32xf32, #tpu.memory_space<vmem>>, vector<2x8x32xf32>
    %46 = vector.shape_cast %45 : vector<2x8x32xf32> to vector<16x32xf32>
    %47 = tpu.concatenate %38, %40, %42, %44, %46 in 1 : vector<16x32xf32>, vector<16x32xf32>, vector<16x32xf32>, vector<16x32xf32>, vector<16x32xf32> -> vector<16x160xf32>
    %48 = arith.truncf %47 : vector<16x160xf32> to vector<16x160xbf16>
    %cst_59 = arith.constant dense<0.000000e+00> : vector<16x32xf32>
    %49 = tpu.matmul %48, %35, %cst_59 {dimension_numbers = #tpu.dot_dimension_numbers<[1], [0], [0], [1], [0, 0, 1, 1], [], []>} : vector<16x160xbf16>, vector<160x32xbf16>, vector<16x32xf32> -> vector<16x32xf32>
    %50 = vector.broadcast %36 : vector<1x32xf32> to vector<16x32xf32>
    %51 = arith.addf %49, %50 : vector<16x32xf32>
    %52 = math.tanh %51 : vector<16x32xf32>
    %53 = vector.shape_cast %52 : vector<16x32xf32> to vector<2x8x32xf32>
    %c1_60 = arith.constant 1 : index
    %c0_61 = arith.constant 0 : index
    %c0_62 = arith.constant 0 : index
    %c0_63 = arith.constant 0 : index
    %54 = vector.load %arg11[%c1_60, %c0_61, %c0_62, %c0_63] : memref<4x2x4x32xf32, #tpu.memory_space<vmem>>, vector<1x2x4x32xf32>
    %55 = vector.shape_cast %54 : vector<1x2x4x32xf32> to vector<2x4x32xf32>
    %c0_64 = arith.constant 0 : index
    %c4_65 = arith.constant 4 : index
    %c0_66 = arith.constant 0 : index
    %56 = vector.load %arg10[%c0_64, %c4_65, %c0_66] : memref<2x16x32xf32, #tpu.memory_space<vmem>>, vector<2x4x32xf32>
    tpu.vector_store %arg10[%c0_64, %c4_65, %c0_66], %55 {strides = array<i32>} : memref<2x16x32xf32, #tpu.memory_space<vmem>>, vector<2x4x32xf32>,
    %57 = vector.extract_strided_slice %53 {offsets = [0, 4, 0], sizes = [2, 4, 32], strides = [1, 1, 1]} : vector<2x8x32xf32> to vector<2x4x32xf32>
    %c1_67 = arith.constant 1 : index
    %c0_68 = arith.constant 0 : index
    %c0_69 = arith.constant 0 : index
    %c0_70 = arith.constant 0 : index
    %58 = vector.load %arg11[%c1_67, %c0_68, %c0_69, %c0_70] : memref<4x2x4x32xf32, #tpu.memory_space<vmem>>, vector<1x2x4x32xf32>
    %59 = vector.shape_cast %58 : vector<1x2x4x32xf32> to vector<2x4x32xf32>
    %60 = vector.shape_cast %57 : vector<2x4x32xf32> to vector<1x2x4x32xf32>
    tpu.vector_store %arg11[%c1_67, %c0_68, %c0_69, %c0_70], %60 {strides = array<i32>} : memref<4x2x4x32xf32, #tpu.memory_space<vmem>>, vector<1x2x4x32xf32>,
    %c0_71 = arith.constant 0 : index
    %c8_72 = arith.constant 8 : index
    %c0_73 = arith.constant 0 : index
    %61 = vector.load %arg10[%c0_71, %c8_72, %c0_73] : memref<2x16x32xf32, #tpu.memory_space<vmem>>, vector<2x8x32xf32>
    tpu.vector_store %arg10[%c0_71, %c8_72, %c0_73], %53 {strides = array<i32>} : memref<2x16x32xf32, #tpu.memory_space<vmem>>, vector<2x8x32xf32>,
    %c1_74 = arith.constant 1 : index
    %c0_75 = arith.constant 0 : index
    %c0_76 = arith.constant 0 : index
    %62 = vector.load %arg4[%c1_74, %c0_75, %c0_76] : memref<3x160x32xbf16, #tpu.memory_space<vmem>>, vector<1x160x32xbf16>
    %63 = vector.shape_cast %62 : vector<1x160x32xbf16> to vector<160x32xbf16>
    %c2 = arith.constant 2 : index
    %c0_77 = arith.constant 0 : index
    %64 = vector.load %arg6[%c2, %c0_77] : memref<4x32xf32, #tpu.memory_space<vmem>>, vector<1x32xf32>
    %c0_78 = arith.constant 0 : index
    %c4_79 = arith.constant 4 : index
    %c0_80 = arith.constant 0 : index
    %65 = vector.load %arg10[%c0_78, %c4_79, %c0_80] : memref<2x16x32xf32, #tpu.memory_space<vmem>>, vector<2x8x32xf32>
    %66 = vector.shape_cast %65 : vector<2x8x32xf32> to vector<16x32xf32>
    %c0_81 = arith.constant 0 : index
    %c5_82 = arith.constant 5 : index
    %c0_83 = arith.constant 0 : index
    %67 = vector.load %arg10[%c0_81, %c5_82, %c0_83] : memref<2x16x32xf32, #tpu.memory_space<vmem>>, vector<2x8x32xf32>
    %68 = vector.shape_cast %67 : vector<2x8x32xf32> to vector<16x32xf32>
    %c0_84 = arith.constant 0 : index
    %c6_85 = arith.constant 6 : index
    %c0_86 = arith.constant 0 : index
    %69 = vector.load %arg10[%c0_84, %c6_85, %c0_86] : memref<2x16x32xf32, #tpu.memory_space<vmem>>, vector<2x8x32xf32>
    %70 = vector.shape_cast %69 : vector<2x8x32xf32> to vector<16x32xf32>
    %c0_87 = arith.constant 0 : index
    %c7_88 = arith.constant 7 : index
    %c0_89 = arith.constant 0 : index
    %71 = vector.load %arg10[%c0_87, %c7_88, %c0_89] : memref<2x16x32xf32, #tpu.memory_space<vmem>>, vector<2x8x32xf32>
    %72 = vector.shape_cast %71 : vector<2x8x32xf32> to vector<16x32xf32>
    %c0_90 = arith.constant 0 : index
    %c8_91 = arith.constant 8 : index
    %c0_92 = arith.constant 0 : index
    %73 = vector.load %arg10[%c0_90, %c8_91, %c0_92] : memref<2x16x32xf32, #tpu.memory_space<vmem>>, vector<2x8x32xf32>
    %74 = vector.shape_cast %73 : vector<2x8x32xf32> to vector<16x32xf32>
    %75 = tpu.concatenate %66, %68, %70, %72, %74 in 1 : vector<16x32xf32>, vector<16x32xf32>, vector<16x32xf32>, vector<16x32xf32>, vector<16x32xf32> -> vector<16x160xf32>
    %76 = arith.truncf %75 : vector<16x160xf32> to vector<16x160xbf16>
    %cst_93 = arith.constant dense<0.000000e+00> : vector<16x32xf32>
    %77 = tpu.matmul %76, %63, %cst_93 {dimension_numbers = #tpu.dot_dimension_numbers<[1], [0], [0], [1], [0, 0, 1, 1], [], []>} : vector<16x160xbf16>, vector<160x32xbf16>, vector<16x32xf32> -> vector<16x32xf32>
    %78 = vector.broadcast %64 : vector<1x32xf32> to vector<16x32xf32>
    %79 = arith.addf %77, %78 : vector<16x32xf32>
    %80 = math.tanh %79 : vector<16x32xf32>
    %81 = vector.shape_cast %80 : vector<16x32xf32> to vector<2x8x32xf32>
    %c2_94 = arith.constant 2 : index
    %c0_95 = arith.constant 0 : index
    %c0_96 = arith.constant 0 : index
    %c0_97 = arith.constant 0 : index
    %82 = vector.load %arg11[%c2_94, %c0_95, %c0_96, %c0_97] : memref<4x2x4x32xf32, #tpu.memory_space<vmem>>, vector<1x2x4x32xf32>
    %83 = vector.shape_cast %82 : vector<1x2x4x32xf32> to vector<2x4x32xf32>
    %c0_98 = arith.constant 0 : index
    %c4_99 = arith.constant 4 : index
    %c0_100 = arith.constant 0 : index
    %84 = vector.load %arg10[%c0_98, %c4_99, %c0_100] : memref<2x16x32xf32, #tpu.memory_space<vmem>>, vector<2x4x32xf32>
    tpu.vector_store %arg10[%c0_98, %c4_99, %c0_100], %83 {strides = array<i32>} : memref<2x16x32xf32, #tpu.memory_space<vmem>>, vector<2x4x32xf32>,
    %85 = vector.extract_strided_slice %81 {offsets = [0, 4, 0], sizes = [2, 4, 32], strides = [1, 1, 1]} : vector<2x8x32xf32> to vector<2x4x32xf32>
    %c2_101 = arith.constant 2 : index
    %c0_102 = arith.constant 0 : index
    %c0_103 = arith.constant 0 : index
    %c0_104 = arith.constant 0 : index
    %86 = vector.load %arg11[%c2_101, %c0_102, %c0_103, %c0_104] : memref<4x2x4x32xf32, #tpu.memory_space<vmem>>, vector<1x2x4x32xf32>
    %87 = vector.shape_cast %86 : vector<1x2x4x32xf32> to vector<2x4x32xf32>
    %88 = vector.shape_cast %85 : vector<2x4x32xf32> to vector<1x2x4x32xf32>
    tpu.vector_store %arg11[%c2_101, %c0_102, %c0_103, %c0_104], %88 {strides = array<i32>} : memref<4x2x4x32xf32, #tpu.memory_space<vmem>>, vector<1x2x4x32xf32>,
    %c0_105 = arith.constant 0 : index
    %c8_106 = arith.constant 8 : index
    %c0_107 = arith.constant 0 : index
    %89 = vector.load %arg10[%c0_105, %c8_106, %c0_107] : memref<2x16x32xf32, #tpu.memory_space<vmem>>, vector<2x8x32xf32>
    tpu.vector_store %arg10[%c0_105, %c8_106, %c0_107], %81 {strides = array<i32>} : memref<2x16x32xf32, #tpu.memory_space<vmem>>, vector<2x8x32xf32>,
    %c2_108 = arith.constant 2 : index
    %c0_109 = arith.constant 0 : index
    %c0_110 = arith.constant 0 : index
    %90 = vector.load %arg4[%c2_108, %c0_109, %c0_110] : memref<3x160x32xbf16, #tpu.memory_space<vmem>>, vector<1x160x32xbf16>
    %91 = vector.shape_cast %90 : vector<1x160x32xbf16> to vector<160x32xbf16>
    %c3 = arith.constant 3 : index
    %c0_111 = arith.constant 0 : index
    %92 = vector.load %arg6[%c3, %c0_111] : memref<4x32xf32, #tpu.memory_space<vmem>>, vector<1x32xf32>
    %c0_112 = arith.constant 0 : index
    %c4_113 = arith.constant 4 : index
    %c0_114 = arith.constant 0 : index
    %93 = vector.load %arg10[%c0_112, %c4_113, %c0_114] : memref<2x16x32xf32, #tpu.memory_space<vmem>>, vector<2x8x32xf32>
    %94 = vector.shape_cast %93 : vector<2x8x32xf32> to vector<16x32xf32>
    %c0_115 = arith.constant 0 : index
    %c5_116 = arith.constant 5 : index
    %c0_117 = arith.constant 0 : index
    %95 = vector.load %arg10[%c0_115, %c5_116, %c0_117] : memref<2x16x32xf32, #tpu.memory_space<vmem>>, vector<2x8x32xf32>
    %96 = vector.shape_cast %95 : vector<2x8x32xf32> to vector<16x32xf32>
    %c0_118 = arith.constant 0 : index
    %c6_119 = arith.constant 6 : index
    %c0_120 = arith.constant 0 : index
    %97 = vector.load %arg10[%c0_118, %c6_119, %c0_120] : memref<2x16x32xf32, #tpu.memory_space<vmem>>, vector<2x8x32xf32>
    %98 = vector.shape_cast %97 : vector<2x8x32xf32> to vector<16x32xf32>
    %c0_121 = arith.constant 0 : index
    %c7_122 = arith.constant 7 : index
    %c0_123 = arith.constant 0 : index
    %99 = vector.load %arg10[%c0_121, %c7_122, %c0_123] : memref<2x16x32xf32, #tpu.memory_space<vmem>>, vector<2x8x32xf32>
    %100 = vector.shape_cast %99 : vector<2x8x32xf32> to vector<16x32xf32>
    %c0_124 = arith.constant 0 : index
    %c8_125 = arith.constant 8 : index
    %c0_126 = arith.constant 0 : index
    %101 = vector.load %arg10[%c0_124, %c8_125, %c0_126] : memref<2x16x32xf32, #tpu.memory_space<vmem>>, vector<2x8x32xf32>
    %102 = vector.shape_cast %101 : vector<2x8x32xf32> to vector<16x32xf32>
    %103 = tpu.concatenate %94, %96, %98, %100, %102 in 1 : vector<16x32xf32>, vector<16x32xf32>, vector<16x32xf32>, vector<16x32xf32>, vector<16x32xf32> -> vector<16x160xf32>
    %104 = arith.truncf %103 : vector<16x160xf32> to vector<16x160xbf16>
    %cst_127 = arith.constant dense<0.000000e+00> : vector<16x32xf32>
    %105 = tpu.matmul %104, %91, %cst_127 {dimension_numbers = #tpu.dot_dimension_numbers<[1], [0], [0], [1], [0, 0, 1, 1], [], []>} : vector<16x160xbf16>, vector<160x32xbf16>, vector<16x32xf32> -> vector<16x32xf32>
    %106 = vector.broadcast %92 : vector<1x32xf32> to vector<16x32xf32>
    %107 = arith.addf %105, %106 : vector<16x32xf32>
    %108 = math.tanh %107 : vector<16x32xf32>
    %109 = vector.shape_cast %108 : vector<16x32xf32> to vector<2x8x32xf32>
    %c3_128 = arith.constant 3 : index
    %c0_129 = arith.constant 0 : index
    %c0_130 = arith.constant 0 : index
    %c0_131 = arith.constant 0 : index
    %110 = vector.load %arg11[%c3_128, %c0_129, %c0_130, %c0_131] : memref<4x2x4x32xf32, #tpu.memory_space<vmem>>, vector<1x2x4x32xf32>
    %111 = vector.shape_cast %110 : vector<1x2x4x32xf32> to vector<2x4x32xf32>
    %c0_132 = arith.constant 0 : index
    %c4_133 = arith.constant 4 : index
    %c0_134 = arith.constant 0 : index
    %112 = vector.load %arg10[%c0_132, %c4_133, %c0_134] : memref<2x16x32xf32, #tpu.memory_space<vmem>>, vector<2x4x32xf32>
    tpu.vector_store %arg10[%c0_132, %c4_133, %c0_134], %111 {strides = array<i32>} : memref<2x16x32xf32, #tpu.memory_space<vmem>>, vector<2x4x32xf32>,
    %113 = vector.extract_strided_slice %109 {offsets = [0, 4, 0], sizes = [2, 4, 32], strides = [1, 1, 1]} : vector<2x8x32xf32> to vector<2x4x32xf32>
    %c3_135 = arith.constant 3 : index
    %c0_136 = arith.constant 0 : index
    %c0_137 = arith.constant 0 : index
    %c0_138 = arith.constant 0 : index
    %114 = vector.load %arg11[%c3_135, %c0_136, %c0_137, %c0_138] : memref<4x2x4x32xf32, #tpu.memory_space<vmem>>, vector<1x2x4x32xf32>
    %115 = vector.shape_cast %114 : vector<1x2x4x32xf32> to vector<2x4x32xf32>
    %116 = vector.shape_cast %113 : vector<2x4x32xf32> to vector<1x2x4x32xf32>
    tpu.vector_store %arg11[%c3_135, %c0_136, %c0_137, %c0_138], %116 {strides = array<i32>} : memref<4x2x4x32xf32, #tpu.memory_space<vmem>>, vector<1x2x4x32xf32>,
    %c0_139 = arith.constant 0 : index
    %c8_140 = arith.constant 8 : index
    %c0_141 = arith.constant 0 : index
    %117 = vector.load %arg10[%c0_139, %c8_140, %c0_141] : memref<2x16x32xf32, #tpu.memory_space<vmem>>, vector<2x8x32xf32>
    tpu.vector_store %arg10[%c0_139, %c8_140, %c0_141], %109 {strides = array<i32>} : memref<2x16x32xf32, #tpu.memory_space<vmem>>, vector<2x8x32xf32>,
    %c0_142 = arith.constant 0 : index
    %c0_143 = arith.constant 0 : index
    %118 = vector.load %arg5[%c0_142, %c0_143] : memref<160x128xbf16, #tpu.memory_space<vmem>>, vector<160x128xbf16>
    %c0_144 = arith.constant 0 : index
    %c0_145 = arith.constant 0 : index
    %119 = vector.load %arg7[%c0_144, %c0_145] : memref<1x128xf32, #tpu.memory_space<vmem>>, vector<1x128xf32>
    %c0_146 = arith.constant 0 : index
    %c4_147 = arith.constant 4 : index
    %c0_148 = arith.constant 0 : index
    %120 = vector.load %arg10[%c0_146, %c4_147, %c0_148] : memref<2x16x32xf32, #tpu.memory_space<vmem>>, vector<2x8x32xf32>
    %121 = vector.shape_cast %120 : vector<2x8x32xf32> to vector<16x32xf32>
    %c0_149 = arith.constant 0 : index
    %c5_150 = arith.constant 5 : index
    %c0_151 = arith.constant 0 : index
    %122 = vector.load %arg10[%c0_149, %c5_150, %c0_151] : memref<2x16x32xf32, #tpu.memory_space<vmem>>, vector<2x8x32xf32>
    %123 = vector.shape_cast %122 : vector<2x8x32xf32> to vector<16x32xf32>
    %c0_152 = arith.constant 0 : index
    %c6_153 = arith.constant 6 : index
    %c0_154 = arith.constant 0 : index
    %124 = vector.load %arg10[%c0_152, %c6_153, %c0_154] : memref<2x16x32xf32, #tpu.memory_space<vmem>>, vector<2x8x32xf32>
    %125 = vector.shape_cast %124 : vector<2x8x32xf32> to vector<16x32xf32>
    %c0_155 = arith.constant 0 : index
    %c7_156 = arith.constant 7 : index
    %c0_157 = arith.constant 0 : index
    %126 = vector.load %arg10[%c0_155, %c7_156, %c0_157] : memref<2x16x32xf32, #tpu.memory_space<vmem>>, vector<2x8x32xf32>
    %127 = vector.shape_cast %126 : vector<2x8x32xf32> to vector<16x32xf32>
    %c0_158 = arith.constant 0 : index
    %c8_159 = arith.constant 8 : index
    %c0_160 = arith.constant 0 : index
    %128 = vector.load %arg10[%c0_158, %c8_159, %c0_160] : memref<2x16x32xf32, #tpu.memory_space<vmem>>, vector<2x8x32xf32>
    %129 = vector.shape_cast %128 : vector<2x8x32xf32> to vector<16x32xf32>
    %130 = tpu.concatenate %121, %123, %125, %127, %129 in 1 : vector<16x32xf32>, vector<16x32xf32>, vector<16x32xf32>, vector<16x32xf32>, vector<16x32xf32> -> vector<16x160xf32>
    %131 = arith.truncf %130 : vector<16x160xf32> to vector<16x160xbf16>
    %cst_161 = arith.constant dense<0.000000e+00> : vector<16x128xf32>
    %132 = tpu.matmul %131, %118, %cst_161 {dimension_numbers = #tpu.dot_dimension_numbers<[1], [0], [0], [1], [0, 0, 1, 1], [], []>} : vector<16x160xbf16>, vector<160x128xbf16>, vector<16x128xf32> -> vector<16x128xf32>
    %133 = vector.broadcast %119 : vector<1x128xf32> to vector<16x128xf32>
    %134 = arith.addf %132, %133 : vector<16x128xf32>
    %135 = vector.shape_cast %134 : vector<16x128xf32> to vector<2x8x128xf32>
    %c0_162 = arith.constant 0 : index
    %c0_163 = arith.constant 0 : index
    %c0_164 = arith.constant 0 : index
    %136 = vector.load %arg8[%c0_162, %c0_163, %c0_164] : memref<2x8x128xf32, #tpu.memory_space<vmem>>, vector<2x8x128xf32>
    tpu.vector_store %arg8[%c0_162, %c0_163, %c0_164], %135 {strides = array<i32>} : memref<2x8x128xf32, #tpu.memory_space<vmem>>, vector<2x8x128xf32>,
    return
  }
  func.func @transform_0(%arg0: i32, %arg1: i32) -> (i32, i32, i32) {
    %c0_i32 = arith.constant 0 : i32
    %c0_i32_0 = arith.constant 0 : i32
    return %arg0, %arg1, %c0_i32 : i32, i32, i32
  }
  func.func @transform_1(%arg0: i32, %arg1: i32) -> (i32, i32) {
    %c0_i32 = arith.constant 0 : i32
    %c0_i32_0 = arith.constant 0 : i32
    %c0_i32_1 = arith.constant 0 : i32
    return %c0_i32, %c0_i32_0 : i32, i32
  }
  func.func @transform_2(%arg0: i32, %arg1: i32) -> (i32, i32, i32) {
    %c0_i32 = arith.constant 0 : i32
    %c0_i32_0 = arith.constant 0 : i32
    %c0_i32_1 = arith.constant 0 : i32
    %c0_i32_2 = arith.constant 0 : i32
    return %c0_i32, %c0_i32_0, %c0_i32_1 : i32, i32, i32
  }
  func.func @transform_3(%arg0: i32, %arg1: i32) -> (i32, i32) {
    %c0_i32 = arith.constant 0 : i32
    %c0_i32_0 = arith.constant 0 : i32
    %c0_i32_1 = arith.constant 0 : i32
    return %c0_i32, %c0_i32_0 : i32, i32
  }
  func.func @transform_4(%arg0: i32, %arg1: i32) -> (i32, i32) {
    %c0_i32 = arith.constant 0 : i32
    %c0_i32_0 = arith.constant 0 : i32
    %c0_i32_1 = arith.constant 0 : i32
    return %c0_i32, %c0_i32_0 : i32, i32
  }
  func.func @transform_5(%arg0: i32, %arg1: i32) -> (i32, i32) {
    %c0_i32 = arith.constant 0 : i32
    %c0_i32_0 = arith.constant 0 : i32
    %c0_i32_1 = arith.constant 0 : i32
    return %c0_i32, %c0_i32_0 : i32, i32
  }
  func.func @transform_6(%arg0: i32, %arg1: i32) -> (i32, i32, i32) {
    %c0_i32 = arith.constant 0 : i32
    %c0_i32_0 = arith.constant 0 : i32
    return %arg0, %arg1, %c0_i32 : i32, i32, i32
  }
}

</mosaic_0001>

<bundles_post_ra>
// kernel: postnet_forward.1
= control target key start
LH: loop header
LB: loop body
LE: loop exit
PB: predicated region body
PF: predicated region fallthrough
CT: control target
= control target key end

     0   :  { %s1732_s21 = smov 0   ;;  %s1734_s22 = smov 0   ;;  %s2077_s0 = inlined_call_operand.vmem [shape: f32[2,32,16], index: 0, kind: input, shape index: {}]   ;;  %s2078_s1 = inlined_call_operand.vmem [shape: bf16[80,32], index: 1, kind: input, shape index: {}]   ;;  %s2079_s2 = inlined_call_operand.vmem [shape: bf16[3,160,32], index: 2, kind: input, shape index: {}]   ;;  %s2080_s3 = inlined_call_operand.vmem [shape: bf16[160,128], index: 3, kind: input, shape index: {}]   ;;  %s2081_s4 = inlined_call_operand.vmem [shape: f32[4,32], index: 4, kind: input, shape index: {}]   ;;  %s2082_s5 = inlined_call_operand.vmem [shape: f32[1,128], index: 5, kind: input, shape index: {}]   ;;  %s2083_s6 = inlined_call_operand.vmem [shape: f32[2,32,128], index: 6, kind: output, shape index: {}]  }
   0x1   :  { %s1736_s23 = smov 0   ;;  %s1738_s24 = smov 0  }
   0x2   :  { %s1740_s25 = smov 0  }
   0x3 LB: > { %s25_s26 = sadd.s32 1, %s1682_s24  ;;  %s1329_s27 = sadd.s32 4294967295, %s1686_s25   ;;  %s1686_s25 = sphi %s1740_s25, %s16_s25   ;;  %s1682_s24 = sphi %s1738_s24, %s2088_s24   ;;  %s1678_s23 = sphi %s1736_s23, %s2087_s23   ;;  %s1674_s22 = sphi %s1734_s22, %s2086_s22   ;;  %s1670_s21 = sphi %s1732_s21, %s2085_s21  }
   0x4   : > { %p26_p0 = scmp.ge.s32.totalorder %s25_s26, 4  ;;  %p44_p1 = scmp.ne.s32.totalorder %s1674_s22, %s1670_s21 }
   0x5   : > { %p45_p2 = scmp.eq.s32.totalorder %s1686_s25, 0  ;;  %p181_p4 = scmp.eq.s32.totalorder %s1329_s27, 3 }
   0x6   : > { %s2090_s26 = smov (%p26_p0, %s25_s26), 0  ;;  %s37_s29 = sadd.s32 1, %s1674_s22 }
   0x7   : > { %p46_p3 = por %p45_p2, %p44_p1  ;;  %s33_s28 = ssub.s32 %s1682_s24, %s2090_s26 }
   0x8   : > { %p35_p5 = scmp.eq.s32.totalorder %s33_s28, 0  ;;  %p1767_p6 = por %p181_p4, %p44_p1 }
   0x9   : > { %p1332_p7 = scmp.ge.s32.totalorder %s1686_s25, 4 }
   0xa   : > { %s1772_s7 = scalar_select %p35_p5, %s1674_s22, %s37_s29  }
   0xb   : > { %218 = sbr.rel (%p1332_p7) target bundleno = 25 (0x19), region = 36 }
  0x12   : > { %221 = sbr.rel (!%p46_p3) target bundleno = 25 (0x19), region = 40  ;;  %s223_s8 = sand.u32 (%p46_p3), 1, %s1674_s22  }
  0x13   : > { %s1334_s9 = sshll.u32 (%p46_p3), %s1682_s24, 3  ;;  %s1333_s10 = sshll.u32 (%p46_p3), %s223_s8, 4 }
  0x14   : > { %s230_s13 = scalar_lea.vmem (%p46_p3), %s2077_s0, %s1334_s9  ;;  %s225_s14 = scalar_lea.vmem (%p46_p3), [#allocation5], %s1333_s10 }
  0x15   : > { %v260_v0 = vld [vmem:[%s230_s13] sm:$0xff] (%p46_p3) }
  0x16   : > { %v262_v1 = vld [vmem:[%s230_s13 + $0x20] sm:$0xff] (%p46_p3)  ;;  %261 = vst [vmem:[%s225_s14] sm:$0xff] (%p46_p3), %v260_v0 }
  0x17   : > { %263 = vst [vmem:[%s225_s14 + $0x8] sm:$0xff] (%p46_p3), %v262_v1 }
  0x19 PF: > { %p1335_p8 = scmp.ge.s32.totalorder %s1686_s25, 1  ;;  %p268_p9 = scmp.lt.s32.totalorder %s1686_s25, 5 }
  0x1b   : > { %p269_p10 = pnand %p1335_p8, %p268_p9 }
  0x1c   : > { %s275_s15 = sand.u32 (!%p269_p10), 1, %s1670_s21   ;;  %p1338_p11 = scmp.ne.s32.totalorder (!%p269_p10), %s1678_s23, 0 }
  0x1d   : > { %272 = sbr.rel (%p269_p10) target bundleno = 1861 (0x745), region = 78  ;;  %s1336_s16 = sshll.u32 (!%p269_p10), %s275_s15, 4 }
  0x1e   : > { %s277_s17 = scalar_lea.vmem (!%p269_p10), [#allocation5], %s1336_s16  ;;  %s1783_s18 = scalar_lea.vmem (!%p269_p10), [#allocation6], %s1336_s16 }
  0x24   : > { %309 = sbr.rel (%p1338_p11) target bundleno = 43 (0x2b), region = 86  ;;  %vm310_vm0 = vcmask (!%p1338_p11), 125952   ;;  %vm313_vm1 = vcmask (!%p1338_p11), 257024   ;;  %v1688_v2 = vmov (!%p1338_p11), 0.0  }
  0x25   : > { %311 = vst.msk [vmem:[#allocation2 + $0x4] sm:$0xf] (!%p1338_p11), %vm310_vm0, %v1688_v2  ;;  %312 = vst.msk [vmem:[#allocation2 + $0x14] sm:$0xf] (!%p1338_p11), %vm310_vm0, %v1688_v2 }
  0x26   : > { %314 = vst.msk [vmem:[#allocation4] sm:$0xf] (!%p1338_p11), %vm313_vm1, %v1688_v2  ;;  %315 = vst.msk [vmem:[#allocation4 + $0x4] sm:$0xf] (!%p1338_p11), %vm313_vm1, %v1688_v2 }
  0x27   : > { %316 = vst.msk [vmem:[#allocation4 + $0x8] sm:$0xf] (!%p1338_p11), %vm313_vm1, %v1688_v2  ;;  %317 = vst.msk [vmem:[#allocation4 + $0xc] sm:$0xf] (!%p1338_p11), %vm313_vm1, %v1688_v2 }
  0x28   : > { %318 = vst.msk [vmem:[#allocation4 + $0x10] sm:$0xf] (!%p1338_p11), %vm313_vm1, %v1688_v2  ;;  %319 = vst.msk [vmem:[#allocation4 + $0x14] sm:$0xf] (!%p1338_p11), %vm313_vm1, %v1688_v2 }
  0x29   : > { %320 = vst.msk [vmem:[#allocation4 + $0x18] sm:$0xf] (!%p1338_p11), %vm313_vm1, %v1688_v2  ;;  %321 = vst.msk [vmem:[#allocation4 + $0x1c] sm:$0xf] (!%p1338_p11), %vm313_vm1, %v1688_v2 }
  0x2b PF: > { %v322_v3 = vld [vmem:[%s277_s17] sm:$0xff]  ;;  %v323_v4 = vld [vmem:[%s277_s17 + $0x8] sm:$0xff]  ;;  %vm324_vm2 = vcmask 130048   ;;  %v1689_v5 = vmov 0.0   ;;  %vm473_vm3 = vcmask 125952   ;;  %vm1690_vm4 = vmmov 0  }
  0x2c   : > { %325 = vst.msk [vmem:[#allocation2 + $0x8] sm:$0xff] %vm324_vm2, %v322_v3  ;;  %326 = vst.msk [vmem:[#allocation2 + $0x18] sm:$0xff] %vm324_vm2, %v323_v4  ;;  %1444 = vmatprep.subr.bf16.mxu0 %v1689_v5  ;;  %v1587_v6 = vld [vmem:[%s2078_s1] sm:$0xff]   ;;  %v1588_v7 = vld [vmem:[%s2078_s1 + $0x8] sm:$0xff]   ;;  %1454 = vmatprep.mubr.msk.bf16.mxu0 %vm1690_vm4, %v1689_v5  ;;  %s1691_s8 = smov 16   ;;  %s1692_s11 = smov 48  }
  0x2d   : > { %1445 = vmatpush3.bf16.msra.mxu0 %v1587_v6  ;;  %v472_v8 = vld [vmem:[%s277_s17 + $0xc] sm:$0xf]  ;;  %v471_v9 = vld [vmem:[%s277_s17 + $0x4] sm:$0xf]  ;;  %s1693_s14 = smov 32   ;;  %s1694_s15 = smov 64  }
  0x2e   : > { %1446 = vmatprep.subr.bf16.mxu0 %v1689_v5  ;;  %v1589_v10 = vld [vmem:[%s2078_s1 + $0x10] sm:$0xff]   ;;  %v1590_v24 = vld [vmem:[%s2078_s1 + $0x18] sm:$0xff]   ;;  %v1591_v26 = vld [vmem:[%s2078_s1 + $0x20] sm:$0xff]   ;;  %vm382_vm5 = vcmask 261120   ;;  %vm385_vm6 = vcmask 392192   ;;  %vm388_vm7 = vcmask 523264  }
  0x2f   : > { %vm426_vm8 = vcmask 654336   ;;  %v478_v48 = vld [vmem:[#allocation4] sm:$0xf]  ;;  %vm480_vm9 = vcmask 257024   ;;  %v479_v49 = vld [vmem:[#allocation4 + $0x4] sm:$0xf] }
  0x30   : > { %481 = vst.msk [vmem:[#allocation3 + $0x4] sm:$0xf] %vm480_vm9, %v478_v48  ;;  %482 = vst.msk [vmem:[#allocation3 + $0x14] sm:$0xf] %vm480_vm9, %v479_v49  ;;  %v1592_v50 = vld [vmem:[%s2079_s2] sm:$0xff]   ;;  %v1695_v51 = vmov 0  }
  0x31   : > { %1447 = vmatpush3.bf16.msra.mxu0 %v1588_v7  ;;  %619 = vmatprep.subr.bf16.mxu1 %v1695_v51  ;;  %v1593_v52 = vld [vmem:[%s2079_s2 + $0x8] sm:$0xff]   ;;  %v1594_v53 = vld [vmem:[%s2079_s2 + $0x10] sm:$0xff]   ;;  %v1595_v54 = vld [vmem:[%s2079_s2 + $0x18] sm:$0xff]   ;;  %vm483_vm10 = vcmask 261124   ;;  %vm547_vm11 = vcmask 785408  }
  0x32   : > { %1448 = vmatprep.subr.bf16.mxu0 %v1689_v5  ;;  %620 = vmatpush1.bf16.msra.mxu1 %v1592_v50  ;;  %v1596_v55 = vld [vmem:[%s2079_s2 + $0x20] sm:$0xff]   ;;  %v1597_v56 = vld [vmem:[%s2079_s2 + $0x28] sm:$0xff]   ;;  %v1598_v57 = vld [vmem:[%s2079_s2 + $0x30] sm:$0xff]  }
  0x33   : > { %v340_v11 = vld [vmem:[#allocation2 + $0x5] sm:$0xff]  ;;  %v341_v12 = vld [vmem:[#allocation2 + $0x15] sm:$0xff]  ;;  %621 = vmatprep.subr.bf16.mxu1 %v1695_v51  ;;  %v1339_v59 = vld [vmem:[%s2081_s4] ss:$0 sm:$0xff] }
  0x34   : > { %v344_v13 = vld [vmem:[#allocation2 + $0x7] sm:$0xff]  ;;  %v1507_v14 = vpack.i.bf16 %v341_v12, %v340_v11  ;;  %v345_v15 = vld [vmem:[#allocation2 + $0x17] sm:$0xff] }
  0x35   : > { %v342_v16 = vld [vmem:[#allocation2 + $0x6] sm:$0xff]  ;;  %v343_v17 = vld [vmem:[#allocation2 + $0x16] sm:$0xff]  ;;  %v1517_v18 = vpack.i.bf16 %v345_v15, %v344_v13  ;;  %1449 = vmatpush3.bf16.msra.mxu0 %v1589_v10 }
  0x36   : > { %v346_v19 = vld [vmem:[#allocation2 + $0x8] sm:$0xff]  ;;  %v347_v20 = vld [vmem:[#allocation2 + $0x18] sm:$0xff]  ;;  %1508 = vrot.lane.b32.xlu0 %v1507_v14, %s1691_s8  ;;  %v1512_v22 = vpack.i.bf16 %v343_v17, %v342_v16  ;;  %1450 = vmatprep.subr.bf16.mxu0 %v1689_v5  ;;  %v1600_v3 = vld [vmem:[%s2079_s2 + $0x40] sm:$0xff]   ;;  %s1696_s8 = smov 96  }
  0x37   : > { %v339_v21 = vld [vmem:[#allocation2 + $0x14] sm:$0xff]  ;;  %v338_v23 = vld [vmem:[#allocation2 + $0x4] sm:$0xff]  ;;  %1518 = vrot.lane.b32.xlu1 %v1517_v18, %s1692_s11  ;;  %v1522_v25 = vpack.i.bf16 %v347_v20, %v346_v19  ;;  %622 = vmatpush1.bf16.msra.mxu1 %v1593_v52 }
  0x38   : > { %475 = vst.msk [vmem:[#allocation2 + $0x14] sm:$0xf] %vm473_vm3, %v472_v8  ;;  %474 = vst.msk [vmem:[#allocation2 + $0x4] sm:$0xf] %vm473_vm3, %v471_v9  ;;  %623 = vmatprep.subr.bf16.mxu1 %v1695_v51  ;;  %v1599_v58 = vld [vmem:[%s2079_s2 + $0x38] sm:$0xff]  }
  0x39   : > { %1451 = vmatpush3.bf16.msra.mxu0 %v1590_v24 }
  0x3a   : > { %1513 = vrot.lane.b32.xlu0 %v1512_v22, %s1693_s14  ;;  %1452 = vmatprep.subr.bf16.mxu0 %v1689_v5  ;;  %v1601_v5 = vld [vmem:[%s2079_s2 + $0x48] sm:$0xff]  }
  0x3b   : > { %1523 = vrot.lane.b32.xlu1 %v1522_v25, %s1694_s15  ;;  %624 = vmatpush1.bf16.msra.mxu1 %v1594_v53 }
  0x3c   : > { %625 = vmatprep.subr.bf16.mxu1 %v1695_v51 }
  0x3d   : > { %1453 = vmatpush3.bf16.msra.mxu0 %v1591_v26 }
  0x3e   : > { %802 = vmatprep.subr.bf16.mxu0 %v1695_v51 }
  0x3f   : > { %626 = vmatpush1.bf16.msra.mxu1 %v1595_v54 }
  0x40   : > { %627 = vmatprep.subr.bf16.mxu1 %v1695_v51 }
  0x43   : > { %628 = vmatpush1.bf16.msra.mxu1 %v1596_v55  ;;  %v1610_v55 = vld [vmem:[%s2079_s2 + $0x90] sm:$0xff]  }
  0x44   : > { %629 = vmatprep.subr.bf16.mxu1 %v1695_v51 }
  0x47   : > { %630 = vmatpush1.bf16.msra.mxu1 %v1597_v56 }
  0x48   : > { %631 = vmatprep.subr.bf16.mxu1 %v1695_v51 }
  0x4b   : > { %632 = vmatpush1.bf16.msra.mxu1 %v1598_v57  ;;  %v1611_v57 = vld [vmem:[%s2079_s2 + $0x98] sm:$0xff]  }
  0x4c   : > { %633 = vmatprep.subr.bf16.mxu1 %v1695_v51 }
  0x4f   : > { %634 = vmatpush1.bf16.msra.mxu1 %v1599_v58 }
  0x50   : > { %635 = vmatprep.subr.bf16.mxu1 %v1695_v51 }
  0x53   : > { %636 = vmatpush1.bf16.msra.mxu1 %v1600_v3 }
  0x54   : > { %637 = vmatprep.subr.bf16.mxu1 %v1695_v51 }
  0x57   : > { %638 = vmatpush1.bf16.msra.mxu1 %v1601_v5 }
  0x58   : > { %985 = vmatprep.subr.bf16.mxu1 %v1695_v51 }
  0xa8   : > { %v1509_v27 = vpop.permute.xlu0 %1508 }
  0xa9   : > { %v1519_v28 = vpop.permute.xlu1 %1518  ;;  %v1511_v29 = vunpack.i.h.bf16 %v1509_v27  ;;  %v1510_v30 = vunpack.i.l.bf16 %v1509_v27 }
  0xaa   : > { %v1521_v32 = vunpack.i.h.bf16 %v1519_v28  ;;  %v1520_v33 = vunpack.i.l.bf16 %v1519_v28 }
  0xab   : > { %v381_v37 = vsel %vm324_vm2, %v339_v21, %v1511_v29  ;;  %v380_v38 = vsel %vm324_vm2, %v338_v23, %v1510_v30 }
  0xac   : > { %v1514_v31 = vpop.permute.xlu0 %1513 }
  0xad   : > { %v1516_v34 = vunpack.i.h.bf16 %v1514_v31  ;;  %v1515_v35 = vunpack.i.l.bf16 %v1514_v31  ;;  %v1524_v36 = vpop.permute.xlu1 %1523 }
  0xae   : > { %v1526_v39 = vunpack.i.h.bf16 %v1524_v36  ;;  %v1525_v40 = vunpack.i.l.bf16 %v1524_v36  ;;  %v663_v36 = vld [vmem:[#allocation4 + $0x8] sm:$0xf] }
  0xaf   : > { %v383_v41 = vsel %vm382_vm5, %v380_v38, %v1515_v35  ;;  %v384_v42 = vsel %vm382_vm5, %v381_v37, %v1516_v34  ;;  %v664_v37 = vld [vmem:[#allocation4 + $0xc] sm:$0xf]  ;;  %v1602_v38 = vld [vmem:[%s2079_s2 + $0x50] sm:$0xff]  }
  0xb0   : > { %v386_v43 = vsel %vm385_vm6, %v383_v41, %v1520_v33  ;;  %v387_v44 = vsel %vm385_vm6, %v384_v42, %v1521_v32  ;;  %v1605_v41 = vld [vmem:[%s2079_s2 + $0x68] sm:$0xff]   ;;  %v1606_v42 = vld [vmem:[%s2079_s2 + $0x70] sm:$0xff]  }
  0xb1   : > { %v389_v45 = vsel %vm388_vm7, %v386_v43, %v1525_v40  ;;  %v390_v46 = vsel %vm388_vm7, %v387_v44, %v1526_v39  ;;  %v1603_v39 = vld [vmem:[%s2079_s2 + $0x58] sm:$0xff]   ;;  %v1604_v40 = vld [vmem:[%s2079_s2 + $0x60] sm:$0xff]  }
  0xb2   : > { %v391_v47 = vpack.c.bf16 %v390_v46, %v389_v45  ;;  %v1607_v43 = vld [vmem:[%s2079_s2 + $0x78] sm:$0xff]   ;;  %v1608_v44 = vld [vmem:[%s2079_s2 + $0x80] sm:$0xff]   ;;  %v1609_v45 = vld [vmem:[%s2079_s2 + $0x88] sm:$0xff]  }
  0xb3   : > { %v1346_v46 = vld [vmem:[%s2081_s4 + $0x1] ss:$0 sm:$0xff] }
  0xb4   : > { %1455 = vmatmul.mubr.msk.bf16.vlgmr.msra.gmra.mrb[0].mxu0 %vm426_vm8, %v391_v47 }
  0xb5   : > { %803 = vmatpush1.bf16.msra.mxu0 %v1602_v38 }
  0xb6   : > { %804 = vmatprep.subr.bf16.mxu0 %v1695_v51 }
  0xb9   : > { %805 = vmatpush1.bf16.msra.mxu0 %v1603_v39 }
  0xba   : > { %806 = vmatprep.subr.bf16.mxu0 %v1695_v51 }
  0xbd   : > { %807 = vmatpush1.bf16.msra.mxu0 %v1604_v40 }
  0xbe   : > { %808 = vmatprep.subr.bf16.mxu0 %v1695_v51 }
  0xc1   : > { %809 = vmatpush1.bf16.msra.mxu0 %v1605_v41 }
  0xc2   : > { %810 = vmatprep.subr.bf16.mxu0 %v1695_v51 }
  0xc5   : > { %811 = vmatpush1.bf16.msra.mxu0 %v1606_v42  ;;  %v1620_v42 = vld [vmem:[%s2079_s2 + $0xe0] sm:$0xff]  }
  0xc6   : > { %812 = vmatprep.subr.bf16.mxu0 %v1695_v51 }
  0xc9   : > { %813 = vmatpush1.bf16.msra.mxu0 %v1607_v43 }
  0xca   : > { %814 = vmatprep.subr.bf16.mxu0 %v1695_v51 }
  0xcd   : > { %815 = vmatpush1.bf16.msra.mxu0 %v1608_v44  ;;  %v1621_v44 = vld [vmem:[%s2079_s2 + $0xe8] sm:$0xff]  }
  0xce   : > { %816 = vmatprep.subr.bf16.mxu0 %v1695_v51 }
  0xd1   : > { %817 = vmatpush1.bf16.msra.mxu0 %v1609_v45 }
  0xd2   : > { %818 = vmatprep.subr.bf16.mxu0 %v1695_v51 }
  0xd5   : > { %819 = vmatpush1.bf16.msra.mxu0 %v1610_v55 }
  0xd6   : > { %820 = vmatprep.subr.bf16.mxu0 %v1695_v51 }
  0xd9   : > { %821 = vmatpush1.bf16.msra.mxu0 %v1611_v57 }
  0xda   : > { %1169 = vmatprep.subr.bf16.mxu0 %v1695_v51 }
 0x187   : > { %v464_v60 = vpop.f32.mrb[0].mxu0 }
 0x188   : > { %v465_v61 = vadd.f32 %v1339_v59, %v464_v60  ;;  %v1456_v62 = vpop.f32.mrb[1].mxu0 }
 0x189   : > { %v467_v63 = vpop.f32.mrb[2].mxu0 }
 0x18a   : > { %1632 = vtanh.f32 %v465_v61  ;;  %v468_v0 = vadd.f32 %v1339_v59, %v467_v63  ;;  %v1457_v1 = vpop.f32.mrb[3].mxu0 }
 0x18c   : > { %1634 = vtanh.f32 %v468_v0 }
 0x194   : > { %v1633_v2 = vpop.eup %1632 }
 0x195   : > { %484 = vst.msk [vmem:[#allocation4 - $0x4] sm:$0xf0] %vm483_vm10, %v1633_v2 }
 0x196   : > { %486 = vst.msk [vmem:[#allocation3 + $0x8] sm:$0xff] %vm382_vm5, %v1633_v2  ;;  %v1635_v4 = vpop.eup %1634 }
 0x197   : > { %485 = vst.msk [vmem:[#allocation4] sm:$0xf0] %vm483_vm10, %v1635_v4 }
 0x198   : > { %487 = vst.msk [vmem:[#allocation3 + $0x18] sm:$0xff] %vm382_vm5, %v1635_v4 }
 0x19d   : > { %v517_v6 = vld [vmem:[#allocation3 + $0x8] sm:$0xff] }
 0x19e   : > { %v513_v7 = vld [vmem:[#allocation3 + $0x6] sm:$0xff] }
 0x19f   : > { %v511_v8 = vld [vmem:[#allocation3 + $0x5] sm:$0xff]  ;;  %v518_v9 = vld [vmem:[#allocation3 + $0x18] sm:$0xff] }
 0x1a0   : > { %v514_v10 = vld [vmem:[#allocation3 + $0x16] sm:$0xff]  ;;  %v551_v12 = vpack.c.bf16 %v518_v9, %v517_v6  ;;  %v515_v16 = vld [vmem:[#allocation3 + $0x7] sm:$0xff] }
 0x1a1   : > { %v512_v11 = vld [vmem:[#allocation3 + $0x15] sm:$0xff]  ;;  %v1532_v13 = vpack.i.bf16 %v514_v10, %v513_v7  ;;  %v509_v24 = vld [vmem:[#allocation3 + $0x4] sm:$0xff] }
 0x1a2   : > { %v1527_v14 = vpack.i.bf16 %v512_v11, %v511_v8  ;;  %1357 = vmatprep.mubr.msk.bf16.mxu1 %vm382_vm5, %v551_v12  ;;  %v516_v15 = vld [vmem:[#allocation3 + $0x17] sm:$0xff]  ;;  %665 = vst.msk [vmem:[#allocation3 + $0x4] sm:$0xf] %vm480_vm9, %v663_v36 }
 0x1a3   : > { %1533 = vrot.lane.b32.xlu1 %v1532_v13, %s1694_s15  ;;  %v1537_v17 = vpack.i.bf16 %v516_v15, %v515_v16  ;;  %v510_v25 = vld [vmem:[#allocation3 + $0x14] sm:$0xff] }
 0x1a4   : > { %1528 = vrot.lane.b32.xlu0 %v1527_v14, %s1693_s14  ;;  %666 = vst.msk [vmem:[#allocation3 + $0x14] sm:$0xf] %vm480_vm9, %v664_v37 }
 0x1a8   : > { %1538 = vrot.lane.b32.xlu0 %v1537_v17, %s1696_s8 }
 0x215   : > { %v1534_v18 = vpop.permute.xlu1 %1533 }
 0x216   : > { %v1529_v19 = vpop.permute.xlu0 %1528  ;;  %v1536_v22 = vunpack.i.h.bf16 %v1534_v18  ;;  %v1535_v23 = vunpack.i.l.bf16 %v1534_v18 }
 0x217   : > { %v1531_v20 = vunpack.i.h.bf16 %v1529_v19  ;;  %v1530_v21 = vunpack.i.l.bf16 %v1529_v19 }
 0x219   : > { %v543_v26 = vsel %vm382_vm5, %v509_v24, %v1530_v21  ;;  %v544_v27 = vsel %vm382_vm5, %v510_v25, %v1531_v20  ;;  %v846_v24 = vld [vmem:[#allocation4 + $0x10] sm:$0xf]  ;;  %v847_v25 = vld [vmem:[#allocation4 + $0x14] sm:$0xf] }
 0x21a   : > { %v1539_v28 = vpop.permute.xlu0 %1538  ;;  %v545_v31 = vsel %vm388_vm7, %v543_v26, %v1535_v23  ;;  %v546_v32 = vsel %vm388_vm7, %v544_v27, %v1536_v22  ;;  %v1612_v26 = vld [vmem:[%s2079_s2 + $0xa0] sm:$0xff]   ;;  %v1613_v27 = vld [vmem:[%s2079_s2 + $0xa8] sm:$0xff]  }
 0x21b   : > { %v1541_v29 = vunpack.i.h.bf16 %v1539_v28  ;;  %v1540_v30 = vunpack.i.l.bf16 %v1539_v28  ;;  %v1614_v28 = vld [vmem:[%s2079_s2 + $0xb0] sm:$0xff]  }
 0x21d   : > { %v548_v33 = vsel %vm547_vm11, %v545_v31, %v1540_v30  ;;  %v549_v34 = vsel %vm547_vm11, %v546_v32, %v1541_v29  ;;  %v1615_v29 = vld [vmem:[%s2079_s2 + $0xb8] sm:$0xff]   ;;  %v1616_v30 = vld [vmem:[%s2079_s2 + $0xc0] sm:$0xff]   ;;  %v1617_v31 = vld [vmem:[%s2079_s2 + $0xc8] sm:$0xff]  }
 0x21e   : > { %v550_v35 = vpack.c.bf16 %v549_v34, %v548_v33  ;;  %v1618_v32 = vld [vmem:[%s2079_s2 + $0xd0] sm:$0xff]   ;;  %v1619_v33 = vld [vmem:[%s2079_s2 + $0xd8] sm:$0xff]   ;;  %v1378_v34 = vld [vmem:[%s2081_s4 + $0x2] ss:$0 sm:$0xff] }
 0x220   : > { %652 = vmatmul.mubr.bf16.vlgmr.msra.gmra.mrb[0].mxu1 %v550_v35 }
 0x221   : > { %986 = vmatpush1.bf16.msra.mxu1 %v1612_v26 }
 0x222   : > { %987 = vmatprep.subr.bf16.mxu1 %v1695_v51 }
 0x225   : > { %988 = vmatpush1.bf16.msra.mxu1 %v1613_v27 }
 0x226   : > { %989 = vmatprep.subr.bf16.mxu1 %v1695_v51 }
 0x229   : > { %990 = vmatpush1.bf16.msra.mxu1 %v1614_v28 }
 0x22a   : > { %991 = vmatprep.subr.bf16.mxu1 %v1695_v51 }
 0x22d   : > { %992 = vmatpush1.bf16.msra.mxu1 %v1615_v29 }
 0x22e   : > { %993 = vmatprep.subr.bf16.mxu1 %v1695_v51 }
 0x231   : > { %994 = vmatpush1.bf16.msra.mxu1 %v1616_v30  ;;  %v1630_v30 = vld [vmem:[%s2080_s3 + $0x40] sm:$0xff]  }
 0x232   : > { %995 = vmatprep.subr.bf16.mxu1 %v1695_v51 }
 0x235   : > { %996 = vmatpush1.bf16.msra.mxu1 %v1617_v31 }
 0x236   : > { %997 = vmatprep.subr.bf16.mxu1 %v1695_v51 }
 0x239   : > { %998 = vmatpush1.bf16.msra.mxu1 %v1618_v32  ;;  %v1631_v32 = vld [vmem:[%s2080_s3 + $0x48] sm:$0xff]  }
 0x23a   : > { %999 = vmatprep.subr.bf16.mxu1 %v1695_v51 }
 0x23d   : > { %1000 = vmatpush1.bf16.msra.mxu1 %v1619_v33 }
 0x23e   : > { %1001 = vmatprep.subr.bf16.mxu1 %v1695_v51 }
 0x241   : > { %1002 = vmatpush1.bf16.msra.mxu1 %v1620_v42 }
 0x242   : > { %1003 = vmatprep.subr.bf16.mxu1 %v1695_v51 }
 0x245   : > { %1004 = vmatpush1.bf16.msra.mxu1 %v1621_v44 }
 0x2f3   : > { %v653_v47 = vpop.f32.mrb[0].mxu1 }
 0x2f4   : > { %v654_v48 = vadd.f32 %v1346_v46, %v653_v47  ;;  %v655_v49 = vpop.f32.mrb[1].mxu1 }
 0x2f5   : > { %v656_v50 = vpop.f32.mrb[2].mxu1 }
 0x2f6   : > { %1636 = vtanh.f32 %v654_v48  ;;  %v657_v52 = vadd.f32 %v1346_v46, %v656_v50  ;;  %v658_v53 = vpop.f32.mrb[3].mxu1 }
 0x2f8   : > { %1638 = vtanh.f32 %v657_v52 }
 0x300   : > { %v1637_v54 = vpop.eup %1636 }
 0x301   : > { %667 = vst.msk [vmem:[#allocation4 + $0x4] sm:$0xf0] %vm483_vm10, %v1637_v54 }
 0x302   : > { %669 = vst.msk [vmem:[#allocation3 + $0x8] sm:$0xff] %vm382_vm5, %v1637_v54  ;;  %v1639_v56 = vpop.eup %1638 }
 0x303   : > { %668 = vst.msk [vmem:[#allocation4 + $0x8] sm:$0xf0] %vm483_vm10, %v1639_v56 }
 0x304   : > { %670 = vst.msk [vmem:[#allocation3 + $0x18] sm:$0xff] %vm382_vm5, %v1639_v56 }
 0x309   : > { %v701_v58 = vld [vmem:[#allocation3 + $0x8] sm:$0xff] }
 0x30a   : > { %v697_v59 = vld [vmem:[#allocation3 + $0x6] sm:$0xff] }
 0x30b   : > { %v695_v60 = vld [vmem:[#allocation3 + $0x5] sm:$0xff]  ;;  %v702_v61 = vld [vmem:[#allocation3 + $0x18] sm:$0xff] }
 0x30c   : > { %v698_v62 = vld [vmem:[#allocation3 + $0x16] sm:$0xff]  ;;  %v734_v0 = vpack.c.bf16 %v702_v61, %v701_v58  ;;  %v699_v4 = vld [vmem:[#allocation3 + $0x7] sm:$0xff] }
 0x30d   : > { %v696_v63 = vld [vmem:[#allocation3 + $0x15] sm:$0xff]  ;;  %v1547_v1 = vpack.i.bf16 %v698_v62, %v697_v59  ;;  %v693_v13 = vld [vmem:[#allocation3 + $0x4] sm:$0xff] }
 0x30e   : > { %v1542_v2 = vpack.i.bf16 %v696_v63, %v695_v60  ;;  %1389 = vmatprep.mubr.msk.bf16.mxu0 %vm382_vm5, %v734_v0  ;;  %v700_v3 = vld [vmem:[#allocation3 + $0x17] sm:$0xff]  ;;  %848 = vst.msk [vmem:[#allocation3 + $0x4] sm:$0xf] %vm480_vm9, %v846_v24 }
 0x30f   : > { %1548 = vrot.lane.b32.xlu0 %v1547_v1, %s1694_s15  ;;  %v1552_v5 = vpack.i.bf16 %v700_v3, %v699_v4  ;;  %v694_v12 = vld [vmem:[#allocation3 + $0x14] sm:$0xff] }
 0x310   : > { %1543 = vrot.lane.b32.xlu1 %v1542_v2, %s1693_s14  ;;  %849 = vst.msk [vmem:[#allocation3 + $0x14] sm:$0xf] %vm480_vm9, %v847_v25 }
 0x314   : > { %1553 = vrot.lane.b32.xlu1 %v1552_v5, %s1696_s8 }
 0x381   : > { %v1549_v6 = vpop.permute.xlu0 %1548 }
 0x382   : > { %v1544_v7 = vpop.permute.xlu1 %1543  ;;  %v1551_v10 = vunpack.i.h.bf16 %v1549_v6  ;;  %v1550_v11 = vunpack.i.l.bf16 %v1549_v6 }
 0x383   : > { %v1546_v8 = vunpack.i.h.bf16 %v1544_v7  ;;  %v1545_v9 = vunpack.i.l.bf16 %v1544_v7 }
 0x385   : > { %v728_v14 = vsel %vm382_vm5, %v694_v12, %v1546_v8  ;;  %v727_v15 = vsel %vm382_vm5, %v693_v13, %v1545_v9  ;;  %v1029_v12 = vld [vmem:[#allocation4 + $0x18] sm:$0xf]  ;;  %v1030_v13 = vld [vmem:[#allocation4 + $0x1c] sm:$0xf] }
 0x386   : > { %v1554_v16 = vpop.permute.xlu1 %1553  ;;  %v729_v19 = vsel %vm388_vm7, %v727_v15, %v1550_v11  ;;  %v730_v20 = vsel %vm388_vm7, %v728_v14, %v1551_v10  ;;  %v1622_v14 = vld [vmem:[%s2080_s3] sm:$0xff]   ;;  %v1623_v15 = vld [vmem:[%s2080_s3 + $0x8] sm:$0xff]  }
 0x387   : > { %v1556_v17 = vunpack.i.h.bf16 %v1554_v16  ;;  %v1555_v18 = vunpack.i.l.bf16 %v1554_v16  ;;  %v1624_v16 = vld [vmem:[%s2080_s3 + $0x10] sm:$0xff]  }
 0x389   : > { %v731_v21 = vsel %vm547_vm11, %v729_v19, %v1555_v18  ;;  %v732_v22 = vsel %vm547_vm11, %v730_v20, %v1556_v17  ;;  %v1625_v17 = vld [vmem:[%s2080_s3 + $0x18] sm:$0xff]   ;;  %v1626_v18 = vld [vmem:[%s2080_s3 + $0x20] sm:$0xff]   ;;  %v1627_v19 = vld [vmem:[%s2080_s3 + $0x28] sm:$0xff]  }
 0x38a   : > { %v733_v23 = vpack.c.bf16 %v732_v22, %v731_v21  ;;  %v1628_v20 = vld [vmem:[%s2080_s3 + $0x30] sm:$0xff]   ;;  %v1629_v21 = vld [vmem:[%s2080_s3 + $0x38] sm:$0xff]   ;;  %v1410_v22 = vld [vmem:[%s2081_s4 + $0x3] ss:$0 sm:$0xff] }
 0x38c   : > { %835 = vmatmul.mubr.bf16.vlgmr.msra.gmra.mrb[4].mxu0 %v733_v23 }
 0x38d   : > { %1170 = vmatpush1.bf16.msra.mxu0 %v1622_v14 }
 0x38e   : > { %1171 = vmatprep.subr.bf16.mxu0 %v1695_v51 }
 0x391   : > { %1172 = vmatpush1.bf16.msra.mxu0 %v1623_v15 }
 0x392   : > { %1173 = vmatprep.subr.bf16.mxu0 %v1695_v51 }
 0x395   : > { %1174 = vmatpush1.bf16.msra.mxu0 %v1624_v16 }
 0x396   : > { %1175 = vmatprep.subr.bf16.mxu0 %v1695_v51 }
 0x399   : > { %1176 = vmatpush1.bf16.msra.mxu0 %v1625_v17 }
 0x39a   : > { %1177 = vmatprep.subr.bf16.mxu0 %v1695_v51 }
 0x39d   : > { %1178 = vmatpush1.bf16.msra.mxu0 %v1626_v18 }
 0x39e   : > { %1179 = vmatprep.subr.bf16.mxu0 %v1695_v51 }
 0x3a1   : > { %1180 = vmatpush1.bf16.msra.mxu0 %v1627_v19 }
 0x3a2   : > { %1181 = vmatprep.subr.bf16.mxu0 %v1695_v51 }
 0x3a5   : > { %1182 = vmatpush1.bf16.msra.mxu0 %v1628_v20 }
 0x3a6   : > { %1183 = vmatprep.subr.bf16.mxu0 %v1695_v51 }
 0x3a9   : > { %1184 = vmatpush1.bf16.msra.mxu0 %v1629_v21 }
 0x3aa   : > { %1185 = vmatprep.subr.bf16.mxu0 %v1695_v51 }
 0x3ad   : > { %1186 = vmatpush1.bf16.msra.mxu0 %v1630_v30 }
 0x3ae   : > { %1187 = vmatprep.subr.bf16.mxu0 %v1695_v51 }
 0x3b1   : > { %1188 = vmatpush1.bf16.msra.mxu0 %v1631_v32 }
 0x45f   : > { %v836_v35 = vpop.f32.mrb[4].mxu0 }
 0x460   : > { %v837_v36 = vadd.f32 %v1378_v34, %v836_v35  ;;  %v838_v37 = vpop.f32.mrb[5].mxu0 }
 0x461   : > { %v839_v38 = vpop.f32.mrb[6].mxu0 }
 0x462   : > { %1640 = vtanh.f32 %v837_v36  ;;  %v840_v39 = vadd.f32 %v1378_v34, %v839_v38  ;;  %v841_v40 = vpop.f32.mrb[7].mxu0 }
 0x464   : > { %1642 = vtanh.f32 %v840_v39 }
 0x46c   : > { %v1641_v41 = vpop.eup %1640 }
 0x46d   : > { %850 = vst.msk [vmem:[#allocation4 + $0xc] sm:$0xf0] %vm483_vm10, %v1641_v41 }
 0x46e   : > { %852 = vst.msk [vmem:[#allocation3 + $0x8] sm:$0xff] %vm382_vm5, %v1641_v41  ;;  %v1643_v43 = vpop.eup %1642 }
 0x46f   : > { %851 = vst.msk [vmem:[#allocation4 + $0x10] sm:$0xf0] %vm483_vm10, %v1643_v43 }
 0x470   : > { %853 = vst.msk [vmem:[#allocation3 + $0x18] sm:$0xff] %vm382_vm5, %v1643_v43 }
 0x475   : > { %v884_v45 = vld [vmem:[#allocation3 + $0x8] sm:$0xff] }
 0x476   : > { %v880_v46 = vld [vmem:[#allocation3 + $0x6] sm:$0xff] }
 0x477   : > { %v878_v47 = vld [vmem:[#allocation3 + $0x5] sm:$0xff]  ;;  %v885_v48 = vld [vmem:[#allocation3 + $0x18] sm:$0xff] }
 0x478   : > { %v881_v49 = vld [vmem:[#allocation3 + $0x16] sm:$0xff]  ;;  %v917_v52 = vpack.c.bf16 %v885_v48, %v884_v45  ;;  %v882_v56 = vld [vmem:[#allocation3 + $0x7] sm:$0xff] }
 0x479   : > { %v879_v50 = vld [vmem:[#allocation3 + $0x15] sm:$0xff]  ;;  %v1562_v53 = vpack.i.bf16 %v881_v49, %v880_v46  ;;  %v876_v1 = vld [vmem:[#allocation3 + $0x4] sm:$0xff] }
 0x47a   : > { %v1557_v54 = vpack.i.bf16 %v879_v50, %v878_v47  ;;  %1421 = vmatprep.mubr.msk.bf16.mxu1 %vm382_vm5, %v917_v52  ;;  %v883_v55 = vld [vmem:[#allocation3 + $0x17] sm:$0xff]  ;;  %1031 = vst.msk [vmem:[#allocation3 + $0x4] sm:$0xf] %vm480_vm9, %v1029_v12 }
 0x47b   : > { %1563 = vrot.lane.b32.xlu1 %v1562_v53, %s1694_s15  ;;  %v1567_v57 = vpack.i.bf16 %v883_v55, %v882_v56  ;;  %v877_v0 = vld [vmem:[#allocation3 + $0x14] sm:$0xff] }
 0x47c   : > { %1558 = vrot.lane.b32.xlu0 %v1557_v54, %s1693_s14  ;;  %1032 = vst.msk [vmem:[#allocation3 + $0x14] sm:$0xf] %vm480_vm9, %v1030_v13 }
 0x480   : > { %1568 = vrot.lane.b32.xlu0 %v1567_v57, %s1696_s8 }
 0x4ed   : > { %v1564_v58 = vpop.permute.xlu1 %1563 }
 0x4ee   : > { %v1559_v59 = vpop.permute.xlu0 %1558  ;;  %v1566_v62 = vunpack.i.h.bf16 %v1564_v58  ;;  %v1565_v63 = vunpack.i.l.bf16 %v1564_v58 }
 0x4ef   : > { %v1561_v60 = vunpack.i.h.bf16 %v1559_v59  ;;  %v1560_v61 = vunpack.i.l.bf16 %v1559_v59 }
 0x4f1   : > { %v911_v2 = vsel %vm382_vm5, %v877_v0, %v1561_v60  ;;  %v910_v3 = vsel %vm382_vm5, %v876_v1, %v1560_v61 }
 0x4f2   : > { %v1569_v4 = vpop.permute.xlu0 %1568  ;;  %v912_v7 = vsel %vm388_vm7, %v910_v3, %v1565_v63  ;;  %v913_v8 = vsel %vm388_vm7, %v911_v2, %v1566_v62  ;;  %v1422_v63 = vld [vmem:[%s2082_s5] ss:$0 sm:$0xff] }
 0x4f3   : > { %v1571_v5 = vunpack.i.h.bf16 %v1569_v4  ;;  %v1570_v6 = vunpack.i.l.bf16 %v1569_v4 }
 0x4f5   : > { %v914_v9 = vsel %vm547_vm11, %v912_v7, %v1570_v6  ;;  %v915_v10 = vsel %vm547_vm11, %v913_v8, %v1571_v5 }
 0x4f6   : > { %v916_v11 = vpack.c.bf16 %v915_v10, %v914_v9 }
 0x4f8   : > { %1018 = vmatmul.mubr.bf16.vlgmr.msra.gmra.mrb[4].mxu1 %v916_v11 }
 0x5cb   : > { %v1019_v23 = vpop.f32.mrb[4].mxu1 }
 0x5cc   : > { %v1020_v24 = vadd.f32 %v1410_v22, %v1019_v23  ;;  %v1021_v25 = vpop.f32.mrb[5].mxu1 }
 0x5cd   : > { %v1022_v26 = vpop.f32.mrb[6].mxu1 }
 0x5ce   : > { %1644 = vtanh.f32 %v1020_v24  ;;  %v1023_v27 = vadd.f32 %v1410_v22, %v1022_v26  ;;  %v1024_v28 = vpop.f32.mrb[7].mxu1 }
 0x5d0   : > { %1646 = vtanh.f32 %v1023_v27 }
 0x5d8   : > { %v1645_v29 = vpop.eup %1644 }
 0x5d9   : > { %1033 = vst.msk [vmem:[#allocation4 + $0x14] sm:$0xf0] %vm483_vm10, %v1645_v29 }
 0x5da   : > { %1035 = vst.msk [vmem:[#allocation3 + $0x8] sm:$0xff] %vm382_vm5, %v1645_v29  ;;  %v1647_v31 = vpop.eup %1646 }
 0x5db   : > { %1034 = vst.msk [vmem:[#allocation4 + $0x18] sm:$0xf0] %vm483_vm10, %v1647_v31 }
 0x5dc   : > { %1036 = vst.msk [vmem:[#allocation3 + $0x18] sm:$0xff] %vm382_vm5, %v1647_v31 }
 0x5e1   : > { %v1066_v33 = vld [vmem:[#allocation3 + $0x8] sm:$0xff] }
 0x5e2   : > { %v1062_v34 = vld [vmem:[#allocation3 + $0x6] sm:$0xff] }
 0x5e3   : > { %v1060_v35 = vld [vmem:[#allocation3 + $0x5] sm:$0xff]  ;;  %v1067_v36 = vld [vmem:[#allocation3 + $0x18] sm:$0xff] }
 0x5e4   : > { %v1063_v37 = vld [vmem:[#allocation3 + $0x16] sm:$0xff]  ;;  %v1099_v39 = vpack.c.bf16 %v1067_v36, %v1066_v33  ;;  %v1064_v51 = vld [vmem:[#allocation3 + $0x7] sm:$0xff] }
 0x5e5   : > { %v1061_v38 = vld [vmem:[#allocation3 + $0x15] sm:$0xff]  ;;  %v1577_v40 = vpack.i.bf16 %v1063_v37, %v1062_v34  ;;  %v1058_v52 = vld [vmem:[#allocation3 + $0x4] sm:$0xff] }
 0x5e6   : > { %v1572_v41 = vpack.i.bf16 %v1061_v38, %v1060_v35  ;;  %1433 = vmatprep.mubr.msk.bf16.mxu0 %vm382_vm5, %v1099_v39  ;;  %v1065_v42 = vld [vmem:[#allocation3 + $0x17] sm:$0xff] }
 0x5e7   : > { %1578 = vrot.lane.b32.xlu0 %v1577_v40, %s1694_s15  ;;  %v1582_v43 = vpack.i.bf16 %v1065_v42, %v1064_v51  ;;  %v1059_v50 = vld [vmem:[#allocation3 + $0x14] sm:$0xff] }
 0x5e8   : > { %1573 = vrot.lane.b32.xlu1 %v1572_v41, %s1693_s14 }
 0x5ec   : > { %1583 = vrot.lane.b32.xlu1 %v1582_v43, %s1696_s8  ;;  %s1435_s8 = sshll.u32 (%p1767_p6), %s1678_s23, 3 }
 0x5ed   : > { %s1223_s12 = scalar_lea.vmem (%p1767_p6), %s2083_s6, %s1435_s8 }
 0x659   : > { %v1579_v44 = vpop.permute.xlu0 %1578 }
 0x65a   : > { %v1574_v45 = vpop.permute.xlu1 %1573  ;;  %v1581_v48 = vunpack.i.h.bf16 %v1579_v44  ;;  %v1580_v49 = vunpack.i.l.bf16 %v1579_v44 }
 0x65b   : > { %v1576_v46 = vunpack.i.h.bf16 %v1574_v45  ;;  %v1575_v47 = vunpack.i.l.bf16 %v1574_v45 }
 0x65d   : > { %v1093_v53 = vsel %vm382_vm5, %v1059_v50, %v1576_v46  ;;  %v1092_v54 = vsel %vm382_vm5, %v1058_v52, %v1575_v47 }
 0x65e   : > { %v1584_v55 = vpop.permute.xlu1 %1583  ;;  %v1094_v58 = vsel %vm388_vm7, %v1092_v54, %v1580_v49  ;;  %v1095_v59 = vsel %vm388_vm7, %v1093_v53, %v1581_v48 }
 0x65f   : > { %v1586_v56 = vunpack.i.h.bf16 %v1584_v55  ;;  %v1585_v57 = vunpack.i.l.bf16 %v1584_v55 }
 0x661   : > { %v1096_v60 = vsel %vm547_vm11, %v1094_v58, %v1585_v57  ;;  %v1097_v61 = vsel %vm547_vm11, %v1095_v59, %v1586_v56 }
 0x662   : > { %v1098_v62 = vpack.c.bf16 %v1097_v61, %v1096_v60 }
 0x664   : > { %1202 = vmatmul.mubr.bf16.vlgmr.msra.gmra.mrb[8].mxu0 %v1098_v62 }
 0x736   : > { %1218 = sbr.rel (!%p1767_p6) target bundleno = 1861 (0x745), region = 90 }
 0x737   : > { %v1203_v0 = vpop.f32.mrb[8].mxu0 }
 0x738   : > { %v1204_v1 = vadd.f32 %v1422_v63, %v1203_v0  ;;  %v1205_v2 = vpop.f32.mrb[9].mxu0 }
 0x739   : > { %v1206_v3 = vpop.f32.mrb[10].mxu0 }
 0x73a   : > { %1210 = vst [vmem:[%s1783_s18] sm:$0xff] %v1204_v1  ;;  %v1207_v4 = vadd.f32 %v1422_v63, %v1206_v3  ;;  %v1208_v5 = vpop.f32.mrb[11].mxu0 }
 0x73c   : > { %1211 = vst [vmem:[%s1783_s18 + $0x8] sm:$0xff] %v1207_v4 }
 0x741   : > { %v1253_v6 = vld [vmem:[%s1783_s18] sm:$0xff] }
 0x742   : > { %1254 = vst [vmem:[%s1223_s12] sm:$0xff] %v1253_v6 }
 0x743   : > { %v1255_v7 = vld [vmem:[%s1783_s18 + $0x8] sm:$0xff] }
 0x744   : > { %1256 = vst [vmem:[%s1223_s12 + $0x20] sm:$0xff] %v1255_v7 }
 0x745 PF: > { %s16_s25 = sadd.s32 1, %s1686_s25   ;;  %s2085_s21 = smov %s1674_s22 }
 0x746   : > { %p13_p12 = scmp.ge.s32.totalorder %s16_s25, 6   ;;  %s2086_s22 = smov %s1772_s7 }
 0x747   : > { %s2087_s23 = smov %s1682_s24  ;;  %s2088_s24 = smov %s2090_s26 }
 0x748   :  { %15 = sbr.rel (!%p13_p12) target bundleno = 3 (0x3), region = 164 }

</bundles_post_ra>
